<compile_context>
chip_gen: v6e
topology: v6e:2x2x1
jax: 0.10.0
libtpu: 0.0.40
codegen_flags: <defaults>
</compile_context>

<pallas_src>
import math
import functools
import numpy as np

import jax
import jax.numpy as jnp
from jax.experimental import pallas as pl
from jax.experimental.pallas import tpu as pltpu


def _make_positional_encoding(max_len: int, d_model: int) -> np.ndarray:
    """Matches Embeddings.create_positinal_encoding exactly (including its
    non-standard frequency for the cosine terms). Requires even d_model."""
    pe = np.zeros((max_len, d_model), dtype=np.float32)
    pos = np.arange(max_len, dtype=np.float64)[:, None]        # (L, 1)
    i = np.arange(0, d_model, 2, dtype=np.float64)[None, :]    # (1, D/2)
    pe[:, 0::2] = np.sin(pos / 10000 ** (2 * i / d_model))
    pe[:, 1::2] = np.cos(pos / 10000 ** (2 * (i + 1) / d_model))
    return pe


def _embeddings_kernel(x_ref, w_ref, b_ref, pe_ref, o_ref, *, scale):
    # x_ref : (TB, TL, 1)  VMEM  — per-block slice of "encoded words"
    # w_ref : (1, D)       VMEM  — ConvTranspose1d kernel (weight[0, 0, :])
    # b_ref : (1,)         SMEM  — ConvTranspose1d bias (scalar)
    # pe_ref: (TL, D)      VMEM  — positional-encoding slice
    # o_ref : (TB, TL, D)  VMEM
    x = x_ref[...]                      # (TB, TL, 1)
    w = w_ref[...]                      # (1, D)
    bias = b_ref[0]                     # scalar from SMEM
    # Pure VPU broadcast multiply: (TB,TL,1) * (1,1,D) -> (TB,TL,D).
    emb = x * w[None, :, :]
    out = (emb + bias) * scale + pe_ref[...][None, :, :]
    o_ref[...] = out.astype(o_ref.dtype)


def _pick_tile(extent, bytes_per_unit, budget_bytes, align=8):
    """Largest t dividing `extent` with t*bytes_per_unit <= budget_bytes.
    t must be a multiple of `align` unless t == extent (full-dim blocks are
    always legal). Falls back to the full extent if no such divisor exists."""
    if extent * bytes_per_unit <= budget_bytes:
        return extent
    for t in range(extent - 1, 0, -1):
        if extent % t:
            continue
        if align > 1 and t % align:
            continue
        if t * bytes_per_unit <= budget_bytes:
            return t
    return extent


def embeddings_forward(encoded_words, weight, bias, pe, d_model, max_len, *,
                       out_dtype=jnp.float32,
                       seq_block_bytes=1 << 20,
                       out_block_bytes=4 << 20):
    """encoded_words: (B, 1, max_len) float32 (PyTorch NCL layout).
    Returns (B, max_len, d_model)."""
    B = encoded_words.shape[0]
    L, D = max_len, d_model

    # (B, 1, L) -> (B, L, 1): free reshape (channel dim is 1, no data movement).
    x = encoded_words.reshape(B, L, 1).astype(jnp.float32)
    w = weight.reshape(1, D).astype(jnp.float32)
    b = bias.reshape(1).astype(jnp.float32)
    pe = pe.astype(jnp.float32)

    itemsize = jnp.dtype(out_dtype).itemsize
    # Sequence tile sized so one pe slice is ~seq_block_bytes, then fuse batch
    # elements until the output block reaches ~out_block_bytes.
    TL = _pick_tile(L, D * itemsize, seq_block_bytes, align=8)
    TB = _pick_tile(B, TL * D * itemsize, out_block_bytes, align=1)
    # seq outer / batch inner: pe and w block indices are constant across the
    # inner axis, so Pallas does not re-DMA them between consecutive steps.
    grid = (L // TL, B // TB)

    scale = math.sqrt(d_model)
    kernel = functools.partial(_embeddings_kernel, scale=scale)

    return pl.pallas_call(
        kernel,
        out_shape=jax.ShapeDtypeStruct((B, L, D), out_dtype),
        grid=grid,
        in_specs=[
            # x tile: the lane dim of 1 is padded to 128 in VMEM; with TL
            # tiling this is only ~TL*512 B per buffer — negligible next to
            # the (TB, TL, D) output block.
            pl.BlockSpec((TB, TL, 1), lambda j, i: (i, j, 0)),
            pl.BlockSpec((1, D), lambda j, i: (0, 0)),          # weight (resident)
            pl.BlockSpec(memory_space=pltpu.MemorySpace.SMEM),  # bias scalar
            pl.BlockSpec((TL, D), lambda j, i: (j, 0)),         # pe slice (inner-reused)
        ],
        out_specs=pl.BlockSpec((TB, TL, D), lambda j, i: (i, j, 0)),
        compiler_params=pltpu.CompilerParams(
            dimension_semantics=("parallel", "parallel"),
            vmem_limit_bytes=32 * 1024 * 1024,
        ),
    )(x, w, b, pe)


if __name__ == "__main__":
    base_key = jax.random.PRNGKey(0)

    def run_case(case_id, B, max_len, d_model, **fwd_kwargs):
        key = jax.random.fold_in(base_key, case_id)
        k_x, k_w, k_b = jax.random.split(key, 3)

        # Deterministic synthetic parameters (ConvTranspose1d(1,1,d_model) shapes).
        bound = 1.0 / math.sqrt(d_model)
        weight = jax.random.uniform(k_w, (1, 1, d_model), jnp.float32, -bound, bound)
        bias = jax.random.uniform(k_b, (1,), jnp.float32, -bound, bound)
        pe = jnp.asarray(_make_positional_encoding(max_len, d_model))

        # Input "encoded words": (B, 1, max_len) in NCL layout.
        encoded_words = jax.random.normal(k_x, (B, 1, max_len), jnp.float32)

        out = embeddings_forward(encoded_words, weight, bias, pe,
                                 d_model, max_len, **fwd_kwargs)
        out = jax.block_until_ready(out)

        # Pure-JAX reference.
        ref = (encoded_words[:, 0, :, None] * weight.reshape(1, 1, d_model)
               + bias[0]) * math.sqrt(d_model) + pe[None, :, :]
        assert out.shape == (B, max_len, d_model), (B, max_len, d_model)
        assert jnp.allclose(out, ref, atol=1e-5, rtol=1e-5), (B, max_len, d_model)

    # Toy shape from the module (d_model=32 < 128 lanes: correct, masked stores).
    run_case(0, B=2, max_len=8, d_model=32)
    # Lane-dense configuration (d_model multiple of 128): the intended fast path.
    run_case(1, B=2, max_len=16, d_model=128)
    # Force a multi-block grid (2x2) to exercise the tiled / batch-fused path.
    run_case(2, B=4, max_len=64, d_model=128,
             seq_block_bytes=16 * 1024, out_block_bytes=32 * 1024)

    print("KERNEL_OK")
</pallas_src>

<mosaic_0001>
module attributes {stable_mosaic.version = 11 : i64} {
  func.func @_embeddings_kernel(%arg0: i32, %arg1: i32, %arg2: memref<2x8x1xf32, #tpu.memory_space<vmem>>, %arg3: memref<1x32xf32, #tpu.memory_space<vmem>>, %arg4: memref<1xf32, #tpu.memory_space<smem>>, %arg5: memref<8x32xf32, #tpu.memory_space<vmem>>, %arg6: memref<2x8x32xf32, #tpu.memory_space<vmem>>) attributes {dimension_semantics = [#tpu.dimension_semantics<parallel>, #tpu.dimension_semantics<parallel>], iteration_bounds = array<i64: 1, 1>, scalar_prefetch = 0 : i64, scratch_operands = 0 : i64, tpu.core_type = #tpu.core_type<tc>, window_params = [{transform_indices = @transform_0, window_bounds = array<i64: 2, 8, 1>}, {pipeline_mode = #tpu.pipeline_mode<synchronous>, transform_indices = @transform_1, window_bounds = array<i64: 1, 32>}, {transform_indices = @transform_2, window_bounds = array<i64: 1>}, {transform_indices = @transform_3, window_bounds = array<i64: 8, 32>}, {transform_indices = @transform_4, window_bounds = array<i64: 2, 8, 32>}]} {
    %c0 = arith.constant 0 : index
    %c0_0 = arith.constant 0 : index
    %c0_1 = arith.constant 0 : index
    %0 = vector.load %arg2[%c0, %c0_0, %c0_1] : memref<2x8x1xf32, #tpu.memory_space<vmem>>, vector<2x8x1xf32>
    %c0_2 = arith.constant 0 : index
    %c0_3 = arith.constant 0 : index
    %1 = vector.load %arg3[%c0_2, %c0_3] : memref<1x32xf32, #tpu.memory_space<vmem>>, vector<1x32xf32>
    %c0_4 = arith.constant 0 : index
    %2 = memref.load %arg4[%c0_4] : memref<1xf32, #tpu.memory_space<smem>>
    %3 = vector.shape_cast %1 : vector<1x32xf32> to vector<1x1x32xf32>
    %4 = vector.broadcast %0 : vector<2x8x1xf32> to vector<2x8x32xf32>
    %5 = vector.broadcast %3 : vector<1x1x32xf32> to vector<2x8x32xf32>
    %6 = arith.mulf %4, %5 : vector<2x8x32xf32>
    %7 = vector.broadcast %2 : f32 to vector<2x8x32xf32>
    %8 = arith.addf %6, %7 : vector<2x8x32xf32>
    %cst = arith.constant 5.65685415 : f32
    %9 = vector.broadcast %cst : f32 to vector<2x8x32xf32>
    %10 = arith.mulf %8, %9 : vector<2x8x32xf32>
    %c0_5 = arith.constant 0 : index
    %c0_6 = arith.constant 0 : index
    %11 = vector.load %arg5[%c0_5, %c0_6] : memref<8x32xf32, #tpu.memory_space<vmem>>, vector<8x32xf32>
    %12 = vector.shape_cast %11 : vector<8x32xf32> to vector<1x8x32xf32>
    %13 = vector.broadcast %12 : vector<1x8x32xf32> to vector<2x8x32xf32>
    %14 = arith.addf %10, %13 : vector<2x8x32xf32>
    %c0_7 = arith.constant 0 : index
    %c0_8 = arith.constant 0 : index
    %c0_9 = arith.constant 0 : index
    %15 = vector.load %arg6[%c0_7, %c0_8, %c0_9] : memref<2x8x32xf32, #tpu.memory_space<vmem>>, vector<2x8x32xf32>
    tpu.vector_store %arg6[%c0_7, %c0_8, %c0_9], %14 {strides = array<i32>} : memref<2x8x32xf32, #tpu.memory_space<vmem>>, vector<2x8x32xf32>,
    return
  }
  func.func @transform_0(%arg0: i32, %arg1: i32) -> (i32, i32, i32) {
    %c0_i32 = arith.constant 0 : i32
    %c0_i32_0 = arith.constant 0 : i32
    return %arg1, %arg0, %c0_i32 : i32, i32, i32
  }
  func.func @transform_1(%arg0: i32, %arg1: i32) -> (i32, i32) {
    %c0_i32 = arith.constant 0 : i32
    %c0_i32_0 = arith.constant 0 : i32
    %c0_i32_1 = arith.constant 0 : i32
    return %c0_i32, %c0_i32_0 : i32, i32
  }
  func.func @transform_2(%arg0: i32, %arg1: i32) -> i32 {
    %c0_i32 = arith.constant 0 : i32
    %c0_i32_0 = arith.constant 0 : i32
    return %c0_i32 : i32
  }
  func.func @transform_3(%arg0: i32, %arg1: i32) -> (i32, i32) {
    %c0_i32 = arith.constant 0 : i32
    %c0_i32_0 = arith.constant 0 : i32
    return %arg0, %c0_i32 : i32, i32
  }
  func.func @transform_4(%arg0: i32, %arg1: i32) -> (i32, i32, i32) {
    %c0_i32 = arith.constant 0 : i32
    %c0_i32_0 = arith.constant 0 : i32
    return %arg1, %arg0, %c0_i32 : i32, i32, i32
  }
}

</mosaic_0001>

<bundles_post_ra>
// kernel: tpu_custom_call.1
= control target key start
LH: loop header
LB: loop body
LE: loop exit
PB: predicated region body
PF: predicated region fallthrough
CT: control target
= control target key end

     0   :  { %v96_v1 = vmov 0   ;;  %s143_s0 = inlined_call_operand.vmem [shape: f32[2,8,1], index: 0, kind: input, shape index: {}]   ;;  %s144_s1 = inlined_call_operand.vmem [shape: f32[1,32], index: 1, kind: input, shape index: {}]   ;;  %s145_s2 = inlined_call_operand.<no memory space> [shape: f32[1], index: 2, kind: input, shape index: {}]   ;;  %s146_s3 = inlined_call_operand.vmem [shape: f32[8,32], index: 3, kind: input, shape index: {}]   ;;  %s147_s4 = inlined_call_operand.hbm [shape: f32[2,8,32], index: 4, kind: output, shape index: {}]  }
   0x1   :  { %v19_v0 = vld [vmem:[%s143_s0] sm:$0xff]  ;;  %73 = vset.pattern.permute.xlu0 %v96_v1 }
   0x2   :  { %10 = vsyncpa [#allocation4], 0  ;;  %25 = vperm.xlu0 %73, %v19_v0   ;;  %v20_v2 = vld [vmem:[%s143_s0 + $0x8] sm:$0xff]  ;;  %v68_v3 = vld [vmem:[%s144_s1] ss:$0 sm:$0xff]  ;;  %v41_v4 = vstv %s145_s2  ;;  %vm49_vm0 = vcmask 261120  }
   0x3   :  { %v46_v8 = vld [vmem:[%s146_s3] sm:$0xff]  ;;  %s97_s0 = smov [#allocation3]  }
   0x4   :  { %s57_s25 = sshll.u32 %s97_s0, 4  ;;  %s58_s25 = int_to_ptr.vmem [resolvable:$true] %s57_s25 }
   0x5   :  { %s74_s1 = scalar_lea.vmem %s58_s25, 256  ;;  %p79_p1 = scmp.lt.s32.totalorder %s58_s25, %s58_s25 }
   0x6   :  { %30 = vperm.xlu0 %73, %v20_v2   ;;  %p75_p0 = scmp.ne.s32.totalorder %s58_s25, %s74_s1  ;;  %p80_p2 = scmp.lt.s32.totalorder %s74_s1, %s74_s1 }
   0x8   :  { %p81_p3 = por %p80_p2, %p79_p1 }
   0xa   :  { %p82_p4 = pnand %p81_p3, %p75_p0 }
  0x7d   :  { %v26_v5 = vpop.permute.xlu0 %25 }
  0x7e   :  { %v39_v6 = vmul.f32 %v68_v3, %v26_v5 }
  0x80   :  { %v42_v7 = vadd.f32 %v41_v4, %v39_v6 }
  0x81   :  { %v31_v9 = vpop.permute.xlu0 %30 }
  0x82   :  { %v44_v10 = vmul.f32 5.656854, %v42_v7  ;;  %v40_v11 = vmul.f32 %v68_v3, %v31_v9 }
  0x84   :  { %v47_v12 = vadd.f32 %v46_v8, %v44_v10  ;;  %v43_v13 = vadd.f32 %v41_v4, %v40_v11 }
  0x86   :  { %50 = vst.msk [vmem:[#allocation3] sm:$0xff] %vm49_vm0, %v47_v12  ;;  %v45_v14 = vmul.f32 5.656854, %v43_v13 }
  0x88   :  { %v48_v15 = vadd.f32 %v46_v8, %v45_v14 }
  0x8a   :  { %51 = vst.msk [vmem:[#allocation3 + $0x8] sm:$0xff] %vm49_vm0, %v48_v15 }
  0x8b   :  { %85 = shalt.err (!%p82_p4)
}
  0x8c   :  { %s98_s2 = smov 128   ;;  %s99_s3 = smov 8  }
  0x8d   :  { %63 = dma.vmem_to_hbm [thread:$0]  %s58_s25, 256, %s147_s4, [#allocation4], %s98_s2, %s98_s2, %s99_s3  }
  0x8e   :  { %94 = dma.done.wait [#allocation4], 256  }
  0x8f   :  { %95 = vsyncadd [#allocation4], 4294967040 }
  0x90   :  { %67 = vsyncpa [#allocation4], 1 }

</bundles_post_ra>
